<compile_context>
chip_gen: v5e
topology: v5e:2x2
jax: 0.10.0
libtpu: 0.0.40
codegen_flags: <defaults>
</compile_context>

<pallas_src>
import random
from collections import defaultdict

import numpy as np
import jax
import jax.numpy as jnp
from jax import lax
from jax.experimental import pallas as pl
from jax.experimental.pallas import tpu as pltpu


def _round_up(x, m):
    return ((x + m - 1) // m) * m


def _tile_params():
    """Chip-aware tile caps / scoped-VMEM limit."""
    try:
        kind = jax.devices()[0].device_kind.lower()
    except Exception:
        kind = ""
    if "v7" in kind:
        # v7x: 64 MiB VMEM per TC, 2 TCs -> smaller tiles, keep node axis split.
        return dict(max_tile_n=256, max_tile_e=2048,
                    vmem_limit=48 * 1024 * 1024, want_two_node_tiles=True)
    # v5e / v6e: 128 MiB VMEM, single TC -> bigger tiles amortize grid overhead.
    return dict(max_tile_n=512, max_tile_e=4096,
                vmem_limit=64 * 1024 * 1024, want_two_node_tiles=False)


# ------------------------------ fused Pallas kernel ------------------------------

def _fused_sage_kernel(seg_ref, self_ref, msg_ref, wsT_ref, wmT_ref, out_ref):
    # seg_ref:  (1, tE)       int32  local target-row index per message (pad = -1)
    # self_ref: (tN, d_self)  bf16   self features of the target nodes
    # msg_ref:  (tE, d_msg)   bf16   cat([from_node, edge]) features per message
    # wsT_ref:  (d_self, O)   bf16   W[:, :d_self].T, O zero-padded to 128 lanes
    # wmT_ref:  (d_msg, O)    bf16   W[:, d_self:].T, O zero-padded to 128 lanes
    # out_ref:  (tN, O)       f32    accumulator / final relu output (resident across k)
    i = pl.program_id(0)
    k = pl.program_id(1)
    tN = out_ref.shape[0]
    tE = seg_ref.shape[1]

    @pl.when(k == 0)
    def _init():
        out_ref[...] = jnp.dot(self_ref[...], wsT_ref[...],
                               preferred_element_type=jnp.float32)

    # Segment-sum of this edge tile: exact {0,1} mask matmul on the bf16 MXU path.
    row_ids = i * tN + lax.broadcasted_iota(jnp.int32, (tN, tE), 0)
    mask = (row_ids == seg_ref[...]).astype(jnp.bfloat16)                   # (tN, tE)
    agg = jnp.dot(mask, msg_ref[...], preferred_element_type=jnp.float32)   # (tN, d_msg)

    # SageLayer contribution of this edge tile (bf16 MXU, f32 accumulate in out_ref).
    out_ref[...] += jnp.dot(agg.astype(jnp.bfloat16), wmT_ref[...],
                            preferred_element_type=jnp.float32)

    @pl.when(k == pl.num_programs(1) - 1)
    def _finalize():
        out_ref[...] = jnp.maximum(out_ref[...], 0.0)


def fused_sage_layer(self_feats, messages, to_local, wsT, wmT, out_dim):
    """relu(W @ cat([self, segment_sum(messages, to_local)], 1).T).T, one pallas_call."""
    p = _tile_params()
    self_feats = jnp.asarray(self_feats, jnp.bfloat16)
    messages = jnp.asarray(messages, jnp.bfloat16)

    N, d_self = self_feats.shape
    E, d_msg = messages.shape
    O_pad = wsT.shape[1]

    # Node tiles are multiples of 16 sublanes (bf16 operands); edge (reduction)
    # tiles are multiples of 128 lanes.  Capped per chip generation.
    tN = min(p["max_tile_n"], _round_up(max(N, 16), 16))
    if p["want_two_node_tiles"] and N >= 32:
        # Ensure >=2 node tiles so the "parallel" axis feeds both v7x TensorCores.
        tN = min(tN, _round_up((N + 1) // 2, 16))
    tE = min(p["max_tile_e"], _round_up(max(E, 128), 128))
    N_pad = _round_up(N, tN)
    E_pad = _round_up(E, tE)

    seg_p = jnp.pad(jnp.asarray(to_local, jnp.int32).reshape(1, E),
                    ((0, 0), (0, E_pad - E)), constant_values=-1)
    self_p = jnp.pad(self_feats, ((0, N_pad - N), (0, 0)))
    msg_p = jnp.pad(messages, ((0, E_pad - E), (0, 0)))

    out = pl.pallas_call(
        _fused_sage_kernel,
        out_shape=jax.ShapeDtypeStruct((N_pad, O_pad), jnp.float32),
        grid_spec=pltpu.PrefetchScalarGridSpec(
            num_scalar_prefetch=0,
            grid=(N_pad // tN, E_pad // tE),
            in_specs=[
                pl.BlockSpec((1, tE), lambda i, k: (0, k)),           # local target row ids
                pl.BlockSpec((tN, d_self), lambda i, k: (i, 0)),      # self feats
                pl.BlockSpec((tE, d_msg), lambda i, k: (k, 0)),       # fused messages
                pl.BlockSpec((d_self, O_pad), lambda i, k: (0, 0)),   # W_self.T
                pl.BlockSpec((d_msg, O_pad), lambda i, k: (0, 0)),    # W_msg.T
            ],
            out_specs=pl.BlockSpec((tN, O_pad), lambda i, k: (i, 0)),
        ),
        compiler_params=pltpu.CompilerParams(
            dimension_semantics=("parallel", "arbitrary"),
            vmem_limit_bytes=p["vmem_limit"],
        ),
    )(seg_p, self_p, msg_p, wsT, wmT)
    return out[:N, :out_dim]


# ----------------------------- GraphSage model -----------------------------

class GraphSageJAX:
    def __init__(self, input_feature_dim, output_feature_dim, node_features,
                 edge_features, adj_lists, edgeid_to_idx, num_layers=2, seed=42):
        self.input_feature_dim = input_feature_dim
        self.output_feature_dim = output_feature_dim
        self.num_layers = num_layers
        self.node_features = jnp.asarray(node_features, jnp.float32)
        self.edge_features = jnp.asarray(edge_features, jnp.float32)
        self.adj_lists = adj_lists
        self.edgeid_to_idx = edgeid_to_idx

        d_node = self.node_features.shape[1]
        d_edge = self.edge_features.shape[1]
        d_self = input_feature_dim - d_node - d_edge  # width of the self-feature slice
        assert d_self > 0
        self._out_pad = _round_up(output_feature_dim, 128)

        # nn.init.normal_ (mean=0, std=1) on both SageLayer weights, deterministic.
        # Split column-wise into [self | messages], transpose, zero-pad the output
        # dim to 128 lanes and cast to bf16 once here (not per forward call).
        keys = jax.random.split(jax.random.PRNGKey(seed), num_layers)
        self.weights = []
        pad_o = self._out_pad - output_feature_dim
        for l in range(num_layers):
            w = jax.random.normal(keys[l], (output_feature_dim, input_feature_dim),
                                  jnp.float32)
            wsT = jnp.pad(w[:, :d_self].T, ((0, 0), (0, pad_o)))
            wmT = jnp.pad(w[:, d_self:].T, ((0, 0), (0, pad_o)))
            self.weights.append((jnp.asarray(wsT, jnp.bfloat16),
                                 jnp.asarray(wmT, jnp.bfloat16)))

    # ---- host-side graph bookkeeping ----
    # TODO(synk): neighbor sampling, reverse-adjacency construction, and the
    # dict-based edge-id lookup have no clean Pallas equivalent; they stay on host.
    def get_reverse_adj_list(self):
        adj_lists_r = defaultdict(set)
        for k, vs in self.adj_lists.items():
            for v in vs:
                adj_lists_r[v].add(k)
        return adj_lists_r

    def get_lower_layer(self, nodes_batch, sample_num=10):
        adj_lists_r = self.get_reverse_adj_list()
        to_neighs_list = [adj_lists_r[int(node)] for node in nodes_batch]
        samp_neighs_list = [set(random.sample(sorted(tn), sample_num))
                            if len(tn) >= sample_num else set(tn)
                            for tn in to_neighs_list]
        samp_neighs_list = [s | {int(nodes_batch[i])}
                            for i, s in enumerate(samp_neighs_list)]
        samp_edges = np.array([[sn, int(nodes_batch[i])]
                               for i, s in enumerate(samp_neighs_list)
                               for sn in sorted(s)])
        from_index = samp_edges[:, 0]
        unique_from_index = np.unique(from_index)
        return unique_from_index, samp_edges

    def _nodes_map(self, nodes, lower_layer):
        unique_from_index, _ = lower_layer
        unique_nodes = {int(n): i for i, n in enumerate(unique_from_index)}
        return np.array([unique_nodes[int(x)] for x in nodes])

    def _gather_messages(self, lower_layer):
        _, samp_edges = lower_layer
        from_index, to_index = samp_edges[:, 0], samp_edges[:, 1]
        from_states = self.node_features[np.asarray(from_index)]
        edge_idx = np.array([self.edgeid_to_idx[(int(e[0]), int(e[1]))]
                             for e in samp_edges])
        edge_states = self.edge_features[edge_idx]
        # Fused message stream: cat([from_node, edge], dim=1), one matmul in-kernel.
        messages = jnp.concatenate([from_states, edge_states], axis=1)
        return messages, np.asarray(to_index)

    # ---- forward: host bookkeeping + one fused Pallas kernel per layer ----
    def forward(self, nodes_batch):
        upper_layer_nodes = np.array(nodes_batch)
        nodes_batch_layers = [(upper_layer_nodes,)]
        for _ in range(self.num_layers):
            lower_layer_nodes, samp_edges = self.get_lower_layer(upper_layer_nodes)
            nodes_batch_layers.insert(0, (lower_layer_nodes, samp_edges))
            upper_layer_nodes = lower_layer_nodes
        assert len(nodes_batch_layers) == self.num_layers + 1

        pre_hidden_embs = self.node_features
        for layer_idx in range(1, self.num_layers + 1):
            target_nodes = np.asarray(nodes_batch_layers[layer_idx][0])
            lower_layer = nodes_batch_layers[layer_idx - 1]
            messages, to_index = self._gather_messages(lower_layer)
            # Remap message targets to local row indices in `target_nodes`
            # (unique target ids, same assumption as the reference _nodes_map dict).
            order = np.argsort(target_nodes, kind="stable")
            to_local = order[np.searchsorted(target_nodes[order], to_index)].astype(np.int32)
            if layer_idx > 1:
                self_idx = self._nodes_map(target_nodes, lower_layer)
            else:
                self_idx = target_nodes
            self_feats = pre_hidden_embs[np.asarray(self_idx)]
            wsT, wmT = self.weights[layer_idx - 1]
            pre_hidden_embs = fused_sage_layer(self_feats, messages, to_local,
                                               wsT, wmT, self.output_feature_dim)
        return pre_hidden_embs


# ----------------------------------- main -----------------------------------

if __name__ == "__main__":
    random.seed(0)
    np.random.seed(0)
    key = jax.random.PRNGKey(0)

    num_nodes = 12
    d_node = 16
    d_edge = 8
    out_dim = d_node                    # layer-2 self feats are layer-1 outputs
    in_dim = 2 * d_node + d_edge        # cat([self, neighbor, edge]) width = 40

    # deterministic synthetic directed graph
    adj_lists = defaultdict(set)
    for k in range(num_nodes):
        adj_lists[k].add((k + 1) % num_nodes)
        adj_lists[k].add((k + 3) % num_nodes)
        adj_lists[k].add((k + 5) % num_nodes)

    # edge-feature table: every graph edge plus a self-loop edge per node
    edge_list = sorted({(k, v) for k, vs in adj_lists.items() for v in vs}
                       | {(k, k) for k in range(num_nodes)})
    edgeid_to_idx = {e: i for i, e in enumerate(edge_list)}

    kn, ke = jax.random.split(key)
    node_features = jax.random.normal(kn, (num_nodes, d_node), jnp.float32)
    edge_features = jax.random.normal(ke, (len(edge_list), d_edge), jnp.float32)

    model = GraphSageJAX(in_dim, out_dim, node_features, edge_features,
                         adj_lists, edgeid_to_idx, num_layers=2, seed=42)

    nodes_batch = np.array([0, 2, 5, 7])
    out = model.forward(nodes_batch)
    out = jax.block_until_ready(out)

    assert out.shape == (len(nodes_batch), out_dim), out.shape
    assert bool(jnp.all(jnp.isfinite(out)))
    print("KERNEL_OK")
</pallas_src>

<mosaic_0001>
module attributes {stable_mosaic.version = 11 : i64} {
  func.func @_fused_sage_kernel(%arg0: i32, %arg1: i32, %arg2: memref<1x128xi32, #tpu.memory_space<vmem>>, %arg3: memref<16x16xbf16, #tpu.memory_space<vmem>>, %arg4: memref<128x24xbf16, #tpu.memory_space<vmem>>, %arg5: memref<16x128xbf16, #tpu.memory_space<vmem>>, %arg6: memref<24x128xbf16, #tpu.memory_space<vmem>>, %arg7: memref<16x128xf32, #tpu.memory_space<vmem>>) attributes {dimension_semantics = [#tpu.dimension_semantics<parallel>, #tpu.dimension_semantics<arbitrary>], iteration_bounds = array<i64: 1, 1>, scalar_prefetch = 0 : i64, scratch_operands = 0 : i64, tpu.core_type = #tpu.core_type<tc>, window_params = [{transform_indices = @transform_0, window_bounds = array<i64: 1, 128>}, {transform_indices = @transform_1, window_bounds = array<i64: 16, 16>}, {transform_indices = @transform_2, window_bounds = array<i64: 128, 24>}, {pipeline_mode = #tpu.pipeline_mode<synchronous>, transform_indices = @transform_3, window_bounds = array<i64: 16, 128>}, {pipeline_mode = #tpu.pipeline_mode<synchronous>, transform_indices = @transform_4, window_bounds = array<i64: 24, 128>}, {transform_indices = @transform_5, window_bounds = array<i64: 16, 128>}]} {
    %c0_i32 = arith.constant 0 : i32
    %0 = arith.cmpi eq, %arg1, %c0_i32 : i32
    %1 = arith.extui %0 : i1 to i32
    %c0_i32_0 = arith.constant 0 : i32
    %2 = arith.cmpi ne, %1, %c0_i32_0 : i32
    scf.if %2 {
      %c0_13 = arith.constant 0 : index
      %c0_14 = arith.constant 0 : index
      %24 = vector.load %arg3[%c0_13, %c0_14] : memref<16x16xbf16, #tpu.memory_space<vmem>>, vector<16x16xbf16>
      %c0_15 = arith.constant 0 : index
      %c0_16 = arith.constant 0 : index
      %25 = vector.load %arg5[%c0_15, %c0_16] : memref<16x128xbf16, #tpu.memory_space<vmem>>, vector<16x128xbf16>
      %cst_17 = arith.constant dense<0.000000e+00> : vector<16x128xf32>
      %26 = tpu.matmul %24, %25, %cst_17 {dimension_numbers = #tpu.dot_dimension_numbers<[1], [0], [0], [1], [0, 0, 1, 1], [], []>} : vector<16x16xbf16>, vector<16x128xbf16>, vector<16x128xf32> -> vector<16x128xf32>
      %c0_18 = arith.constant 0 : index
      %c0_19 = arith.constant 0 : index
      %27 = vector.load %arg7[%c0_18, %c0_19] : memref<16x128xf32, #tpu.memory_space<vmem>>, vector<16x128xf32>
      tpu.vector_store %arg7[%c0_18, %c0_19], %26 {strides = array<i32>} : memref<16x128xf32, #tpu.memory_space<vmem>>, vector<16x128xf32>,
    } else {
    }
    %c16_i32 = arith.constant 16 : i32
    %3 = arith.muli %arg0, %c16_i32 : i32
    %4 = tpu.iota {dimensions = array<i32: 0>} : vector<16x128xi32>
    %5 = vector.broadcast %3 : i32 to vector<16x128xi32>
    %6 = arith.addi %5, %4 : vector<16x128xi32>
    %c0 = arith.constant 0 : index
    %c0_1 = arith.constant 0 : index
    %7 = vector.load %arg2[%c0, %c0_1] : memref<1x128xi32, #tpu.memory_space<vmem>>, vector<1x128xi32>
    %8 = vector.broadcast %7 : vector<1x128xi32> to vector<16x128xi32>
    %9 = arith.cmpi eq, %6, %8 : vector<16x128xi32>
    %10 = arith.extui %9 : vector<16x128xi1> to vector<16x128xi32>
    %11 = arith.sitofp %10 : vector<16x128xi32> to vector<16x128xf32>
    %12 = arith.truncf %11 : vector<16x128xf32> to vector<16x128xbf16>
    %c0_2 = arith.constant 0 : index
    %c0_3 = arith.constant 0 : index
    %13 = vector.load %arg4[%c0_2, %c0_3] : memref<128x24xbf16, #tpu.memory_space<vmem>>, vector<128x24xbf16>
    %cst = arith.constant dense<0.000000e+00> : vector<16x24xf32>
    %14 = tpu.matmul %12, %13, %cst {dimension_numbers = #tpu.dot_dimension_numbers<[1], [0], [0], [1], [0, 0, 1, 1], [], []>} : vector<16x128xbf16>, vector<128x24xbf16>, vector<16x24xf32> -> vector<16x24xf32>
    %c0_4 = arith.constant 0 : index
    %c0_5 = arith.constant 0 : index
    %15 = vector.load %arg7[%c0_4, %c0_5] : memref<16x128xf32, #tpu.memory_space<vmem>>, vector<16x128xf32>
    %16 = arith.truncf %14 : vector<16x24xf32> to vector<16x24xbf16>
    %c0_6 = arith.constant 0 : index
    %c0_7 = arith.constant 0 : index
    %17 = vector.load %arg6[%c0_6, %c0_7] : memref<24x128xbf16, #tpu.memory_space<vmem>>, vector<24x128xbf16>
    %cst_8 = arith.constant dense<0.000000e+00> : vector<16x128xf32>
    %18 = tpu.matmul %16, %17, %cst_8 {dimension_numbers = #tpu.dot_dimension_numbers<[1], [0], [0], [1], [0, 0, 1, 1], [], []>} : vector<16x24xbf16>, vector<24x128xbf16>, vector<16x128xf32> -> vector<16x128xf32>
    %19 = arith.addf %15, %18 : vector<16x128xf32>
    %c0_9 = arith.constant 0 : index
    %c0_10 = arith.constant 0 : index
    %20 = vector.load %arg7[%c0_9, %c0_10] : memref<16x128xf32, #tpu.memory_space<vmem>>, vector<16x128xf32>
    tpu.vector_store %arg7[%c0_9, %c0_10], %19 {strides = array<i32>} : memref<16x128xf32, #tpu.memory_space<vmem>>, vector<16x128xf32>,
    %c0_i32_11 = arith.constant 0 : i32
    %21 = arith.cmpi eq, %arg1, %c0_i32_11 : i32
    %22 = arith.extui %21 : i1 to i32
    %c0_i32_12 = arith.constant 0 : i32
    %23 = arith.cmpi ne, %22, %c0_i32_12 : i32
    scf.if %23 {
      %c0_13 = arith.constant 0 : index
      %c0_14 = arith.constant 0 : index
      %24 = vector.load %arg7[%c0_13, %c0_14] : memref<16x128xf32, #tpu.memory_space<vmem>>, vector<16x128xf32>
      %cst_15 = arith.constant 0.000000e+00 : f32
      %25 = vector.broadcast %cst_15 : f32 to vector<16x128xf32>
      %26 = arith.maximumf %24, %25 : vector<16x128xf32>
      %c0_16 = arith.constant 0 : index
      %c0_17 = arith.constant 0 : index
      %27 = vector.load %arg7[%c0_16, %c0_17] : memref<16x128xf32, #tpu.memory_space<vmem>>, vector<16x128xf32>
      tpu.vector_store %arg7[%c0_16, %c0_17], %26 {strides = array<i32>} : memref<16x128xf32, #tpu.memory_space<vmem>>, vector<16x128xf32>,
    } else {
    }
    return
  }
  func.func @transform_0(%arg0: i32, %arg1: i32) -> (i32, i32) {
    %c0_i32 = arith.constant 0 : i32
    %c0_i32_0 = arith.constant 0 : i32
    return %c0_i32, %arg1 : i32, i32
  }
  func.func @transform_1(%arg0: i32, %arg1: i32) -> (i32, i32) {
    %c0_i32 = arith.constant 0 : i32
    %c0_i32_0 = arith.constant 0 : i32
    return %arg0, %c0_i32 : i32, i32
  }
  func.func @transform_2(%arg0: i32, %arg1: i32) -> (i32, i32) {
    %c0_i32 = arith.constant 0 : i32
    %c0_i32_0 = arith.constant 0 : i32
    return %arg1, %c0_i32 : i32, i32
  }
  func.func @transform_3(%arg0: i32, %arg1: i32) -> (i32, i32) {
    %c0_i32 = arith.constant 0 : i32
    %c0_i32_0 = arith.constant 0 : i32
    %c0_i32_1 = arith.constant 0 : i32
    return %c0_i32, %c0_i32_0 : i32, i32
  }
  func.func @transform_4(%arg0: i32, %arg1: i32) -> (i32, i32) {
    %c0_i32 = arith.constant 0 : i32
    %c0_i32_0 = arith.constant 0 : i32
    %c0_i32_1 = arith.constant 0 : i32
    return %c0_i32, %c0_i32_0 : i32, i32
  }
  func.func @transform_5(%arg0: i32, %arg1: i32) -> (i32, i32) {
    %c0_i32 = arith.constant 0 : i32
    %c0_i32_0 = arith.constant 0 : i32
    return %arg0, %c0_i32 : i32, i32
  }
}

</mosaic_0001>

<bundles_post_ra>
// kernel: tpu_custom_call.1
= control target key start
LH: loop header
LB: loop body
LE: loop exit
PB: predicated region body
PF: predicated region fallthrough
CT: control target
= control target key end

     0   :  { %s391_s0 = inlined_call_operand.vmem [shape: s32[1,128], index: 0, kind: input, shape index: {}]   ;;  %s392_s1 = inlined_call_operand.vmem [shape: bf16[16,16], index: 1, kind: input, shape index: {}]   ;;  %s393_s2 = inlined_call_operand.vmem [shape: bf16[128,24], index: 2, kind: input, shape index: {}]   ;;  %s394_s3 = inlined_call_operand.vmem [shape: bf16[16,128], index: 3, kind: input, shape index: {}]   ;;  %s395_s4 = inlined_call_operand.vmem [shape: bf16[24,128], index: 4, kind: input, shape index: {}]   ;;  %s396_s5 = inlined_call_operand.hbm [shape: f32[16,128], index: 5, kind: output, shape index: {}]  }
   0x1   :  { %v282_v0 = vld [vmem:[%s393_s2 + $0x38] sm:$0xff]  ;;  %v281_v1 = vld [vmem:[%s393_s2 + $0x30] sm:$0xff]  ;;  %v274_v2 = vld [vmem:[%s394_s3] sm:$0xff] }
   0x2   :  { %141 = vmatpush.bf16.msra.mxu1 %v282_v0 }
   0x3   :  { %10 = vsyncpa [#allocation3], 0  ;;  %52 = vmatpush.bf16.msra.mxu0 %v274_v2  ;;  %v280_v3 = vld [vmem:[%s393_s2 + $0x28] sm:$0xff]  ;;  %v279_v4 = vld [vmem:[%s393_s2 + $0x20] sm:$0xff]  ;;  %v62_v6 = vlaneseq  ;;  %v315_v13 = vmov 1.0|1.0  }
   0x4   :  { %v278_v5 = vld [vmem:[%s393_s2 + $0x18] sm:$0xff]  ;;  %v277_v7 = vld [vmem:[%s393_s2 + $0x10] sm:$0xff]  ;;  %v276_v9 = vld [vmem:[%s393_s2 + $0x8] sm:$0xff]  ;;  %vm41_vm3 = vcmask 130048   ;;  %vm174_vm4 = vcmask 1043456   ;;  %vm170_vm5 = vcmask 195584  }
   0x5   :  { %v63_v8 = vshrl.u32 %v62_v6, 7  ;;  %v288_v11 = vld [vmem:[%s391_s0] ss:$0 sm:$0xff]  ;;  %v160_v14 = vld [vmem:[%s395_s4 + $0x8] sm:$0xf]  ;;  %s211_s19 = sshll.u32 %s396_s5, 4  ;;  %s212_s19 = int_to_ptr.hbm [resolvable:$true] %s211_s19 }
   0x6   :  { %142 = vmatpush.bf16.msra.mxu1 %v281_v1  ;;  %v275_v12 = vld [vmem:[%s393_s2] sm:$0xff]  ;;  %v166_v15 = vunpack.c.l.b16 %v160_v14  ;;  %s318_s20 = smov 8  }
   0x7   :  { %v64_v10 = vadd.s32 8, %v63_v8  ;;  %vm70_vm0 = vcmp.eq.s32.totalorder %v63_v8, %v288_v11  ;;  %v273_v16 = vld [vmem:[%s392_s1] sm:$0xff]  ;;  %s316_s1 = smov [#allocation2]  }
   0x8   :  { %v168_v17 = vpack.c.b16 %v166_v15, %v166_v15  ;;  %231 = vmatmul.msk.bf16.vlgmr.msra.gmra.mxu0 %vm41_vm3, %v273_v16  ;;  %v283_v19 = vld [vmem:[%s395_s4] sm:$0xff]  ;;  %s209_s16 = sshll.u32 %s316_s1, 4  ;;  %s317_s4 = smov 128   ;;  %s210_s16 = int_to_ptr.vmem [resolvable:$true] %s209_s16 }
   0x9   :  { %vm71_vm1 = vcmp.eq.s32.totalorder %v64_v10, %v288_v11 }
   0xa   :  { %143 = vmatpush.bf16.msra.mxu1 %v280_v3  ;;  %vm266_vm2 = vmpackc.low %vm71_vm1, %vm70_vm0  ;;  %v176_v18 = vsel %vm174_vm4, %v168_v17, 0 }
   0xb   :  { %184 = vmatpush.bf16.msra.mxu2 %v176_v18 }
   0xe   :  { %144 = vmatpush.bf16.msra.mxu1 %v279_v4 }
   0xf   :  { %185 = vmatpush.bf16.msra.mxu2 %v283_v19 }
  0x12   :  { %145 = vmatpush.bf16.msra.mxu1 %v278_v5 }
  0x16   :  { %146 = vmatpush.bf16.msra.mxu1 %v277_v7 }
  0x1a   :  { %147 = vmatpush.bf16.msra.mxu1 %v276_v9 }
  0x1e   :  { %148 = vmatpush.bf16.msra.mxu1 %v275_v12 }
  0x21   :  { %267 = vmatmul.msk.bf16.vlgmr.msra.gmra.mxu1 %vm266_vm2, %v315_v13 }
  0x85   :  { %v54_v23 = vpop.f32.mrf.mxu0 }
  0x8d   :  { %v56_v27 = vpop.f32.mrf.mxu0 }
  0x9e   :  { %v150_v20 = vpop.f32.mrf.mxu1 }
  0xa6   :  { %v152_v21 = vpop.f32.mrf.mxu1 }
  0xa7   :  { %v157_v22 = vpack.c.bf16 %v152_v21, %v150_v20 }
  0xa9   :  { %272 = vmatmul.msk.bf16.vlgmr.msra.gmra.mxu2 %vm170_vm5, %v157_v22 }
 0x12c   :  { %v187_v24 = vpop.f32.mrf.mxu2 }
 0x12d   :  { %v192_v25 = vadd.f32 %v187_v24, %v54_v23 }
 0x12f   :  { %v201_v26 = vmax.f32 %v192_v25, 0.0 }
 0x131   :  { %203 = vst [vmem:[#allocation2] sm:$0xff] %v201_v26 }
 0x134   :  { %v189_v28 = vpop.f32.mrf.mxu2 }
 0x135   :  { %v193_v29 = vadd.f32 %v189_v28, %v56_v27 }
 0x137   :  { %v202_v30 = vmax.f32 %v193_v29, 0.0 }
 0x139   :  { %204 = vst [vmem:[#allocation2 + $0x8] sm:$0xff] %v202_v30 }
 0x13a   :  { %217 = dma.vmem_to_hbm [thread:$0]  %s210_s16, 256, %s212_s19, [#allocation3], %s317_s4, %s317_s4, %s318_s20  }
 0x13b   :  { %313 = dma.done.wait [#allocation3], 256  }
 0x13c   :  { %314 = vsyncadd [#allocation3], 4294967040 }
 0x13d   :  { %222 = vsyncpa [#allocation3], 1 }

</bundles_post_ra>
